<compile_context>
chip_gen: v6e
topology: v6e:2x2x1
jax: 0.10.0
libtpu: 0.0.40
codegen_flags: <defaults>
</compile_context>

<pallas_src>
import functools
import math

import jax
import jax.numpy as jnp
from jax.experimental import pallas as pl
from jax.experimental.pallas import tpu as pltpu


def _round_up(x, m):
    return (x + m - 1) // m * m


BN_EPS = 0.2
BN_SCALE = 1.0 / math.sqrt(1.0 + BN_EPS)   # fresh BatchNorm1d in eval mode


# ----------------------------------------------------------------------------
# Fused matmul kernel: C = A @ B (+bias) (+ReLU) (*scale).  K is one block.
# ----------------------------------------------------------------------------
def _mm_kernel(*refs, relu, scale, has_bias):
    if has_bias:
        a_ref, b_ref, bias_ref, o_ref = refs
    else:
        a_ref, b_ref, o_ref = refs
        bias_ref = None
    acc = jnp.dot(a_ref[...], b_ref[...], preferred_element_type=jnp.float32)
    if bias_ref is not None:
        acc = acc + bias_ref[...]
    if relu:
        acc = jnp.maximum(acc, 0.0)
    if scale != 1.0:
        acc = acc * jnp.float32(scale)
    o_ref[...] = acc.astype(o_ref.dtype)


def matmul(a, b, bias=None, relu=False, scale=1.0):
    """C = A @ B on the MXU, bf16 inputs / f32 accumulation.

    M is tiny (<= 32 here) so the whole (Mp, Kp) A panel and full-K B column
    slabs are single blocks: no K grid axis, no accumulator round trip, and
    the bias/ReLU/BN-scale epilogue is fused into the store.
    """
    M, K = a.shape
    K2, N = b.shape
    assert K == K2
    Mp, Kp, Np = _round_up(M, 8), _round_up(K, 128), _round_up(N, 128)

    a_bf = a.astype(jnp.bfloat16)
    if (Mp, Kp) != (M, K):
        a_bf = jnp.zeros((Mp, Kp), jnp.bfloat16).at[:M, :K].set(a_bf)
    b_bf = b.astype(jnp.bfloat16)                 # no-op for pre-cast weights
    if (Kp, Np) != (K, N):
        b_bf = jnp.zeros((Kp, Np), jnp.bfloat16).at[:K, :N].set(b_bf)

    if Np % 512 == 0:
        tn = 512          # double-buffered B slab = 2 x 2 MiB, safe on v5e/v7x
    elif Np % 256 == 0:
        tn = 256
    else:
        tn = 128

    has_bias = bias is not None
    operands = [a_bf, b_bf]
    in_specs = [pl.BlockSpec((Mp, Kp), lambda j: (0, 0)),
                pl.BlockSpec((Kp, tn), lambda j: (0, j))]
    if has_bias:
        bias_p = bias.astype(jnp.float32).reshape(1, -1)
        if bias_p.shape[1] != Np:
            bias_p = jnp.zeros((1, Np), jnp.float32).at[:, :N].set(bias_p)
        operands.append(bias_p)
        in_specs.append(pl.BlockSpec((1, tn), lambda j: (0, j)))

    out = pl.pallas_call(
        functools.partial(_mm_kernel, relu=relu, scale=scale,
                          has_bias=has_bias),
        out_shape=jax.ShapeDtypeStruct((Mp, Np), jnp.float32),
        grid=(Np // tn,),
        in_specs=in_specs,
        out_specs=pl.BlockSpec((Mp, tn), lambda j: (0, j)),
        compiler_params=pltpu.CompilerParams(
            dimension_semantics=("parallel",)),
    )(*operands)
    if (Mp, Np) != (M, N):
        out = out[:M, :N]
    return out


# ----------------------------------------------------------------------------
# GATConv dense attention (8 heads per grid step) fused with GATConv bias,
# F.relu and GraphSizeNorm.  Reads/writes 128-lane column slabs of the native
# (N, heads*128) layout -- no head-major transposes in HBM.
# TODO(synk): for large N, query-tile the (N, N) edge mask (flash-style
#             online softmax) so VMEM stays bounded on v7x (64 MiB).
# ----------------------------------------------------------------------------
def _gat_attn_kernel(xp_ref, asrc_ref, adst_ref, bias_ref, mask_ref,
                     scale_ref, o_ref, *, hb, ch):
    mask = mask_ref[...]                         # (N, N) additive edge mask
    gscale = scale_ref[...]                      # (N, 1) GraphSizeNorm scale
    for h in range(hb):                          # static unroll over heads
        lo = h * ch
        x = xp_ref[:, lo:lo + ch]                # (N, C) lane-aligned slab
        a_src = jnp.sum(x * asrc_ref[h:h + 1, :], axis=-1, keepdims=True)
        a_dst = jnp.sum(x * adst_ref[h:h + 1, :], axis=-1, keepdims=True)
        e = a_dst + a_src.T                      # e[i, j] = dst_i + src_j
        e = jnp.where(e >= 0, e, 0.2 * e)        # LeakyReLU(0.2)
        e = e + mask
        m = jnp.max(e, axis=-1, keepdims=True)
        p = jnp.exp(e - m)
        p = p * pl.reciprocal(jnp.sum(p, axis=-1, keepdims=True), approx=True)
        out = jnp.dot(p, x, preferred_element_type=jnp.float32)
        out = out + bias_ref[h:h + 1, :]
        out = jnp.maximum(out, 0.0)              # F.relu
        o_ref[:, lo:lo + ch] = out * gscale      # GraphSizeNorm


def gat_conv_relu_norm(x, W, att_src, att_dst, bias, edge_mask, node_scale,
                       heads=16, ch=128, heads_per_block=8):
    N = x.shape[0]
    xp = matmul(x, W)                            # (N, heads*ch), native layout
    hb = heads_per_block
    asrc = att_src.reshape(heads, ch).astype(jnp.float32)
    adst = att_dst.reshape(heads, ch).astype(jnp.float32)
    b = bias.reshape(heads, ch).astype(jnp.float32)
    return pl.pallas_call(
        functools.partial(_gat_attn_kernel, hb=hb, ch=ch),
        out_shape=jax.ShapeDtypeStruct((N, heads * ch), jnp.float32),
        grid=(heads // hb,),
        in_specs=[pl.BlockSpec((N, hb * ch), lambda j: (0, j)),
                  pl.BlockSpec((hb, ch), lambda j: (j, 0)),
                  pl.BlockSpec((hb, ch), lambda j: (j, 0)),
                  pl.BlockSpec((hb, ch), lambda j: (j, 0)),
                  pl.BlockSpec((N, N), lambda j: (0, 0)),
                  pl.BlockSpec((N, 1), lambda j: (0, 0))],
        out_specs=pl.BlockSpec((N, hb * ch), lambda j: (0, j)),
        compiler_params=pltpu.CompilerParams(
            dimension_semantics=("parallel",)),
    )(xp, asrc, adst, b, edge_mask, node_scale)


# ----------------------------------------------------------------------------
# GATTP_1 pooling (8 heads per grid step): per-graph masked softmax attention
# pooling over nodes.
# TODO(synk): GATTP_1 source not provided; approximated as multi-head global
#             attention pooling (GAT-style scores, softmax over nodes / graph).
# ----------------------------------------------------------------------------
def _pool_attn_kernel(xp_ref, att_ref, gmask_ref, o_ref, *, hb, ch):
    gmask = gmask_ref[...]                       # (G, N) additive graph mask
    for h in range(hb):
        lo = h * ch
        x = xp_ref[:, lo:lo + ch]                # (N, C)
        s = jnp.sum(x * att_ref[h:h + 1, :], axis=-1, keepdims=True)  # (N, 1)
        s = jnp.where(s >= 0, s, 0.2 * s)        # LeakyReLU(0.2)
        e = s.T + gmask                          # (G, N)
        m = jnp.max(e, axis=-1, keepdims=True)
        p = jnp.exp(e - m)
        p = p * pl.reciprocal(jnp.sum(p, axis=-1, keepdims=True), approx=True)
        o_ref[:, lo:lo + ch] = jnp.dot(p, x, preferred_element_type=jnp.float32)


def gattp_pool(x, W, att, graph_mask, heads=16, ch=128, heads_per_block=8):
    N = x.shape[0]
    G = graph_mask.shape[0]
    xp = matmul(x, W)                            # (N, heads*ch)
    hb = heads_per_block
    att_r = att.reshape(heads, ch).astype(jnp.float32)
    return pl.pallas_call(
        functools.partial(_pool_attn_kernel, hb=hb, ch=ch),
        out_shape=jax.ShapeDtypeStruct((G, heads * ch), jnp.float32),
        grid=(heads // hb,),
        in_specs=[pl.BlockSpec((N, hb * ch), lambda j: (0, j)),
                  pl.BlockSpec((hb, ch), lambda j: (j, 0)),
                  pl.BlockSpec((G, N), lambda j: (0, 0))],
        out_specs=pl.BlockSpec((G, hb * ch), lambda j: (0, j)),
        compiler_params=pltpu.CompilerParams(
            dimension_semantics=("parallel",)),
    )(xp, att_r, graph_mask)


# ----------------------------------------------------------------------------
# JAX glue: radius_graph adjacency, GraphSizeNorm scale, pooling graph mask
# ----------------------------------------------------------------------------
def build_edge_mask(pos, batch, radius):
    """Dense additive attention mask from radius_graph + GATConv self-loops."""
    n = pos.shape[0]
    d2 = jnp.sum((pos[:, None, :] - pos[None, :, :]) ** 2, axis=-1)
    same = batch[:, None] == batch[None, :]
    eye = jnp.eye(n, dtype=bool)
    adj = (d2 <= radius * radius) & same & (~eye)   # radius_graph (no loops)
    adj = adj | eye                                 # GATConv add_self_loops=True
    return jnp.where(adj, 0.0, -1e9).astype(jnp.float32)


def graph_size_scale(batch, num_graphs):
    counts = jnp.zeros((num_graphs,), jnp.float32).at[batch].add(1.0)
    return (1.0 / jnp.sqrt(counts))[batch][:, None]   # (N, 1)


# ----------------------------------------------------------------------------
# Full forward (eval; every Dropout is identity, BatchNorm eval with fresh
# stats == constant 1/sqrt(1+eps) scale fused into the preceding matmul)
# ----------------------------------------------------------------------------
def gat_x3_gattp_mh_forward(params, x, pos, batch, num_graphs, phase="test"):
    radius = 4.0
    edge_mask = build_edge_mask(pos.astype(jnp.float32), batch, radius)
    node_scale = graph_size_scale(batch, num_graphs)

    # lin01: Linear(no bias) -> ReLU -> BatchNorm1d(eps=0.2) -> Dropout(0.8)
    h = matmul(x, params["W_lin01"], relu=True, scale=BN_SCALE)

    # conv1/2/3: GATConv(2048, 128, heads=16) -> F.relu -> GraphSizeNorm -> Drop
    for i in (1, 2, 3):
        h = gat_conv_relu_norm(h, params[f"W_conv{i}"], params[f"att_src{i}"],
                               params[f"att_dst{i}"], params[f"bias{i}"],
                               edge_mask, node_scale, heads=16, ch=128)

    # GATTP_1 multi-head attention pooling -> (num_graphs, 2048)
    gmask = jnp.where(batch[None, :] == jnp.arange(num_graphs)[:, None],
                      0.0, -1e9).astype(jnp.float32)
    h = gattp_pool(h, params["W_pool"], params["att_pool"], gmask,
                   heads=16, ch=128)

    # lin2: Dropout -> Linear(no bias) -> ReLU -> BatchNorm1d(eps=0.2)
    h = matmul(h, params["W_lin2"], relu=True, scale=BN_SCALE)

    # lin3: Linear(1024, 10) with bias (weight pre-padded to 128 lanes at init)
    logits = matmul(h, params["W_lin3"], bias=params["b_lin3"])[:, :10]
    return {"A2": logits}


# ----------------------------------------------------------------------------
# Deterministic parameter init (shapes follow the module's __init__).
# Weights are stored pre-cast to bf16 (and pre-padded where needed) so the
# matmul wrapper never re-copies the big 2048x2048 matrices per call.
# ----------------------------------------------------------------------------
def init_params(key, in_features, n_classes=10):
    ks = jax.random.split(key, 16)

    def w_bf16(k, shape, scale):
        return (jax.random.normal(k, shape, jnp.float32) * scale).astype(
            jnp.bfloat16)

    p = {"W_lin01": w_bf16(ks[0], (in_features, 2048),
                           1.0 / math.sqrt(in_features))}
    for i in (1, 2, 3):
        p[f"W_conv{i}"] = w_bf16(ks[i], (2048, 2048), 1.0 / math.sqrt(2048.0))
        p[f"att_src{i}"] = jax.random.normal(ks[3 + i], (16, 128),
                                             jnp.float32) * 0.1
        p[f"att_dst{i}"] = jax.random.normal(ks[6 + i], (16, 128),
                                             jnp.float32) * 0.1
        p[f"bias{i}"] = jnp.zeros((2048,), jnp.float32)
    p["W_pool"] = w_bf16(ks[10], (2048, 2048), 1.0 / math.sqrt(2048.0))
    p["att_pool"] = jax.random.normal(ks[11], (16, 128), jnp.float32) * 0.1
    p["W_lin2"] = w_bf16(ks[12], (2048, 1024), 1.0 / math.sqrt(2048.0))
    W3 = jax.random.normal(ks[13], (1024, n_classes),
                           jnp.float32) / math.sqrt(1024.0)
    p["W_lin3"] = jnp.zeros((1024, 128), jnp.bfloat16).at[:, :n_classes].set(
        W3.astype(jnp.bfloat16))
    p["b_lin3"] = jnp.zeros((128,), jnp.float32)
    return p


if __name__ == "__main__":
    key = jax.random.PRNGKey(0)
    k_x, k_pos, k_p = jax.random.split(key, 3)

    num_nodes = 32          # 2 graphs x 16 nodes
    num_graphs = 2
    in_features = 256       # small stand-in for the 16928-dim default input

    x = jax.random.normal(k_x, (num_nodes, in_features), jnp.float32)
    pos = jax.random.uniform(k_pos, (num_nodes, 2), jnp.float32, 0.0, 6.0)
    batch = jnp.repeat(jnp.arange(num_graphs, dtype=jnp.int32),
                       num_nodes // num_graphs)

    params = init_params(k_p, in_features)
    out = gat_x3_gattp_mh_forward(params, x, pos, batch, num_graphs,
                                  phase="test")
    logits = jax.block_until_ready(out["A2"])
    assert logits.shape == (num_graphs, 10)
    assert bool(jnp.all(jnp.isfinite(logits)))
    print("KERNEL_OK")
</pallas_src>

<mosaic_0001>
module attributes {stable_mosaic.version = 11 : i64} {
  func.func @_mm_kernel(%arg0: i32, %arg1: memref<32x256xbf16, #tpu.memory_space<vmem>>, %arg2: memref<256x512xbf16, #tpu.memory_space<vmem>>, %arg3: memref<32x512xf32, #tpu.memory_space<vmem>>) attributes {dimension_semantics = [#tpu.dimension_semantics<parallel>], iteration_bounds = array<i64: 4>, scalar_prefetch = 0 : i64, scratch_operands = 0 : i64, tpu.core_type = #tpu.core_type<tc>, window_params = [{pipeline_mode = #tpu.pipeline_mode<synchronous>, transform_indices = @transform_0, window_bounds = array<i64: 32, 256>}, {transform_indices = @transform_1, window_bounds = array<i64: 256, 512>}, {transform_indices = @transform_2, window_bounds = array<i64: 32, 512>}]} {
    %c0 = arith.constant 0 : index
    %c0_0 = arith.constant 0 : index
    %0 = vector.load %arg1[%c0, %c0_0] : memref<32x256xbf16, #tpu.memory_space<vmem>>, vector<32x256xbf16>
    %c0_1 = arith.constant 0 : index
    %c0_2 = arith.constant 0 : index
    %1 = vector.load %arg2[%c0_1, %c0_2] : memref<256x512xbf16, #tpu.memory_space<vmem>>, vector<256x512xbf16>
    %cst = arith.constant dense<0.000000e+00> : vector<32x512xf32>
    %2 = tpu.matmul %0, %1, %cst {dimension_numbers = #tpu.dot_dimension_numbers<[1], [0], [0], [1], [0, 0, 1, 1], [], []>} : vector<32x256xbf16>, vector<256x512xbf16>, vector<32x512xf32> -> vector<32x512xf32>
    %cst_3 = arith.constant 0.000000e+00 : f32
    %3 = vector.broadcast %cst_3 : f32 to vector<32x512xf32>
    %4 = arith.maximumf %2, %3 : vector<32x512xf32>
    %cst_4 = arith.constant 0.912870943 : f32
    %5 = vector.broadcast %cst_4 : f32 to vector<32x512xf32>
    %6 = arith.mulf %4, %5 : vector<32x512xf32>
    %c0_5 = arith.constant 0 : index
    %c0_6 = arith.constant 0 : index
    %7 = vector.load %arg3[%c0_5, %c0_6] : memref<32x512xf32, #tpu.memory_space<vmem>>, vector<32x512xf32>
    tpu.vector_store %arg3[%c0_5, %c0_6], %6 {strides = array<i32>} : memref<32x512xf32, #tpu.memory_space<vmem>>, vector<32x512xf32>,
    return
  }
  func.func @transform_0(%arg0: i32) -> (i32, i32) {
    %c0_i32 = arith.constant 0 : i32
    %c0_i32_0 = arith.constant 0 : i32
    %c0_i32_1 = arith.constant 0 : i32
    return %c0_i32, %c0_i32_0 : i32, i32
  }
  func.func @transform_1(%arg0: i32) -> (i32, i32) {
    %c0_i32 = arith.constant 0 : i32
    %c0_i32_0 = arith.constant 0 : i32
    return %c0_i32, %arg0 : i32, i32
  }
  func.func @transform_2(%arg0: i32) -> (i32, i32) {
    %c0_i32 = arith.constant 0 : i32
    %c0_i32_0 = arith.constant 0 : i32
    return %c0_i32, %arg0 : i32, i32
  }
}

</mosaic_0001>

<bundles_post_ra>
// kernel: tpu_custom_call.1
= control target key start
LH: loop header
LB: loop body
LE: loop exit
PB: predicated region body
PF: predicated region fallthrough
CT: control target
= control target key end

     0   :  { %7 = vsyncpa [#allocation3], 0  ;;  %s1510_s0 = inlined_call_operand.hbm [shape: bf16[32,256], index: 0, kind: input, shape index: {}]   ;;  %s1511_s1 = inlined_call_operand.hbm [shape: bf16[256,2048], index: 1, kind: input, shape index: {}]   ;;  %s1512_s2 = inlined_call_operand.hbm [shape: f32[32,2048], index: 2, kind: output, shape index: {}]  }
   0x1   :  { %8 = vsyncpa [#allocation6], 0 }
   0x2   :  { %10 = vsyncpa [#allocation6 + $0x1], 0 }
   0x3   :  { %11 = vsyncpa [#allocation4], 0 }
   0x4   :  { %13 = vsyncpa [#allocation4 + $0x1], 0  ;;  %s1243_s9 = smov 0   ;;  %s1245_s10 = smov 0  }
   0x5   :  { %s1247_s11 = smov 0   ;;  %s1249_s12 = smov 0  }
   0x6 LB: > { %s1264_s13 = sadd.s32 4294967295, %s1215_s12   ;;  %s840_s14 = sadd.s32 4294967294, %s1215_s12   ;;  %s1215_s12 = sphi %s1249_s12, %s1533_s12   ;;  %s1211_s11 = sphi %s1247_s11, %s1532_s11   ;;  %s1207_s10 = sphi %s1245_s10, %s1531_s10   ;;  %s1203_s9 = sphi %s1243_s9, %s1530_s9  }
   0x7   : > { %s1268_s15 = sadd.s32 1, %s1215_s12   ;;  %s47_s16 = sadd.s32 1, %s1211_s11 }
   0x8   : > { %s44_s17 = ssub.s32 %s1215_s12, %s1268_s15  ;;  %p54_p0 = scmp.ne.s32.totalorder %s1211_s11, %s1207_s10 }
   0x9   : > { %p45_p1 = scmp.eq.s32.totalorder %s44_s17, 0  ;;  %p55_p2 = scmp.eq.s32.totalorder %s1215_s12, 0 }
   0xa   : > { %p60_p3 = scmp.ne.s32.totalorder %s1207_s10, %s1203_s9  ;;  %p1515_p4 = scmp.eq.s32.totalorder %s1264_s13, 0 }
   0xb   : > { %s1280_s18 = scalar_select %p45_p1, %s1211_s11, %s47_s16  }
   0xc   : > { %p1282_p5 = por %p55_p2, %p54_p0  ;;  %p1288_p6 = por %p1515_p4, %p60_p3 }
   0xd   : > { %p84_p7 = scmp.eq.s32.totalorder %s1264_s13, 3  ;;  %p90_p8 = scmp.eq.s32.totalorder %s840_s14, 3 }
   0xe   : > { %s1518_s20 = scalar_select %p1288_p6, 1, 0 }
   0xf   : > { %p841_p9 = scmp.ge.s32.totalorder %s1215_s12, 1  ;;  %p97_p10 = scmp.lt.s32.totalorder %s1215_s12, 5 }
  0x10   : > { %p1295_p11 = por %p84_p7, %p54_p0  ;;  %p1299_p12 = por %p90_p8, %p60_p3 }
  0x11   : > { %p1303_p13 = pnand %p841_p9, %p97_p10  ;;  %s1217_s24 = smov [#allocation2]  }
  0x12   : > { %s1519_s21 = scalar_select %p1295_p11, 1, 0 }
  0x13   : > { %s1520_s22 = scalar_select %p1299_p12, 1, 0 }
  0x14   : > { %s1521_s23 = scalar_select %p1303_p13, 1, 0 }
  0x15   : > { %p934_p1 = pneg %p1303_p13  ;;  %s109_s25 = sshll.u32 %s1217_s24, 4  ;;  %s110_s25 = int_to_ptr.vmem [resolvable:$true] %s109_s25 }
  0x16   : > { %p947_p0 = scmp.lt.s32.totalorder %s1215_s12, 4  ;;  %s123_s27 = sand.u32 1, %s1211_s11  }
  0x17   : > { %p1311_p2 = pnand %p934_p1, %p1515_p4  ;;  %s1104_s28 = scalar_lea.vmem %s110_s25, 512 }
  0x18   : > { %p1105_p7 = scmp.ne.s32.totalorder %s110_s25, %s1104_s28  ;;  %p1112_p10 = scmp.lt.s32.totalorder %s110_s25, %s110_s25 }
  0x19   : > { %p1095_p3 = pneg %p1311_p2  ;;  %p1113_p12 = scmp.lt.s32.totalorder %s1104_s28, %s1104_s28 }
  0x1b   : > { %p1107_p8 = pnand %p1105_p7, %p1095_p3  ;;  %p1114_p11 = por %p1113_p12, %p1112_p10 }
  0x1d   : > { %p1108_p9 = pneg %p1107_p8 }
  0x1f   : > { %p1115_p6 = pnand %p1114_p11, %p1108_p9 }
  0x21   : > { %1118 = shalt.err (!%p1115_p6)
}
  0x22   : > { %s1218_s29 = smov 128   ;;  %s1219_s30 = smov 8  }
  0x23   : > { %937 = dma.hbm_to_vmem [thread:$0]  (!%p1311_p2), %s1510_s0, 512, %s110_s25, [#allocation3], %s1218_s29, %s1218_s29, %s1219_s30  }
  0x24   : > { %p1328_p1 = pnand %p947_p0, %p1282_p5  ;;  %s844_s6 = sshll.u32 %s123_s27, 9 }
  0x25   : > { %s924_s7 = sshll.u32 %s1215_s12, 8  ;;  %s127_s17 = scalar_lea.vmem [#allocation5], %s844_s6 }
  0x26   : > { %s1336_s16 = scalar_lea.hbm %s1511_s1, %s924_s7  ;;  %s134_s24 = sshll.u32 %s127_s17, 4  ;;  %s1338_s24 = int_to_ptr.vmem [resolvable:$true] %s134_s24 }
  0x27   : > { %s1340_s19 = scalar_lea.sflag [#allocation6], %s123_s27  ;;  %s1119_s25 = scalar_lea.hbm %s1336_s16, 8192 }
  0x28   : > { %p1120_p5 = scmp.ne.s32.totalorder %s1336_s16, %s1119_s25  ;;  %p1121_p6 = pneg %p1328_p1 }
  0x29   : > { %s1124_s29 = scalar_lea.hbm %s1511_s1, 32768  ;;  %p1125_p2 = scmp.lt.s32.totalorder %s1336_s16, %s1511_s1 }
  0x2a   : > { %p1122_p11 = pnand %p1121_p6, %p1120_p5  ;;  %p1126_p0 = scmp.lt.s32.totalorder %s1124_s29, %s1119_s25 }
  0x2c   : > { %p1123_p12 = pneg %p1122_p11  ;;  %p1127_p3 = por %p1126_p0, %p1125_p2 }
  0x2e   : > { %p1128_p7 = pnand %p1127_p3, %p1123_p12 }
  0x30   : > { %1131 = shalt.err (!%p1128_p7)
}
  0x31   : > { %s1132_s27 = scalar_lea.vmem %s1338_s24, 8192  ;;  %s1220_s4 = smov [#allocation5]  }
  0x32   : > { %p1133_p8 = scmp.ne.s32.totalorder %s1338_s24, %s1132_s27  ;;  %s1137_s6 = sshll.u32 %s1220_s4, 4  ;;  %s1138_s6 = int_to_ptr.vmem [resolvable:$false] %s1137_s6 }
  0x33   : > { %s1139_s7 = scalar_lea.vmem %s1138_s6, 16384  ;;  %p1140_p5 = scmp.lt.s32.totalorder %s1338_s24, %s1138_s6 }
  0x34   : > { %p1135_p9 = pnand %p1133_p8, %p1121_p6  ;;  %p1141_p11 = scmp.lt.s32.totalorder %s1139_s7, %s1132_s27 }
  0x36   : > { %p1136_p10 = pneg %p1135_p9  ;;  %p1142_p4 = por %p1141_p11, %p1140_p5 }
  0x38   : > { %p1143_p13 = pnand %p1142_p4, %p1136_p10 }
  0x3a   : > { %1146 = shalt.err (!%p1143_p13)
}
  0x3b   : > { %s1221_s8 = smov 1024   ;;  %s1222_s14 = smov 256  }
  0x3c   : > { %s1223_s17 = smov 16   ;;  %p1524_p6 = scmp.ne.s32.totalorder %s1521_s23, 0 }
  0x3d   : > { %941 = dma.hbm_to_vmem [thread:$0]  (!%p1328_p1), %s1336_s16, 8192, %s1338_s24, %s1340_s19, %s1221_s8, %s1222_s14, %s1223_s17  }
  0x3e   : > { %146 = sbr.rel (%p1524_p6) target bundleno = 363 (0x16b), region = 28  ;;  %p1525_p12 = scmp.eq.s32.totalorder (!%p1524_p6), %s1264_s13, 0 }
  0x43   : > { %1190 = dma.done.wait (%p1525_p12), [#allocation3], 512   ;;  %p1526_p2 = pmov %p1525_p12 }
  0x44   : > { %s1368_s25 = sand.u32 1, %s1207_s10   ;;  %p1527_p4 = scmp.ne.s32.totalorder %s1518_s20, 0 }
  0x45   : > { %1192 = vsyncadd (%p1526_p2), [#allocation3], 4294966784  ;;  %s849_s26 = sshll.u32 %s1368_s25, 9  ;;  %s153_s28 = scalar_lea.sflag [#allocation6], %s1368_s25 }
  0x46   : > { %s1372_s29 = scalar_lea.vmem [#allocation5], %s849_s26 }
  0x47   : > { %1194 = dma.done.wait (%p1527_p4), %s153_s28, 8192  }
  0x48   : > { %1196 = vsyncadd (%p1527_p4), %s153_s28, 4294959104  ;;  %v991_v0 = vld [vmem:[%s1372_s29 + $0xe4] ss:$16 sps:$4 sm:$0xff]   ;;  %v993_v1 = vld [vmem:[%s1372_s29 + $0xec] ss:$16 sps:$4 sm:$0xff]   ;;  %s850_s20 = sshll.u32 %s1368_s25, 7 }
  0x49   : > { %587 = vmatprep.subr.bf16.mxu0 %v991_v0  ;;  %v995_v2 = vld [vmem:[%s1372_s29 + $0xe0] ss:$16 sps:$4 sm:$0xff]   ;;  %v996_v3 = vld [vmem:[%s1372_s29 + $0xe8] ss:$16 sps:$4 sm:$0xff]   ;;  %640 = vmatprep.subr.bf16.mxu1 %v993_v1  ;;  %v997_v4 = vld [vmem:[%s1372_s29 + $0xc4] ss:$16 sps:$4 sm:$0xff]  }
  0x4a   : > { %588 = vmatpush1.bf16.msra.mxu0 %v995_v2  ;;  %641 = vmatpush1.bf16.msra.mxu1 %v996_v3  ;;  %v999_v5 = vld [vmem:[%s1372_s29 + $0xcc] ss:$16 sps:$4 sm:$0xff]   ;;  %v1001_v6 = vld [vmem:[%s1372_s29 + $0xc0] ss:$16 sps:$4 sm:$0xff]   ;;  %v1002_v7 = vld [vmem:[%s1372_s29 + $0xc8] ss:$16 sps:$4 sm:$0xff]  }
  0x4b   : > { %589 = vmatprep.subr.bf16.mxu0 %v997_v4  ;;  %642 = vmatprep.subr.bf16.mxu1 %v999_v5  ;;  %v1003_v8 = vld [vmem:[%s1372_s29 + $0xa4] ss:$16 sps:$4 sm:$0xff]   ;;  %v1005_v9 = vld [vmem:[%s1372_s29 + $0xac] ss:$16 sps:$4 sm:$0xff]   ;;  %v1007_v10 = vld [vmem:[%s1372_s29 + $0xa0] ss:$16 sps:$4 sm:$0xff]  }
  0x4c   : > { %v1008_v11 = vld [vmem:[%s1372_s29 + $0xa8] ss:$16 sps:$4 sm:$0xff]   ;;  %v1009_v12 = vld [vmem:[%s1372_s29 + $0x84] ss:$16 sps:$4 sm:$0xff]   ;;  %v1011_v13 = vld [vmem:[%s1372_s29 + $0x8c] ss:$16 sps:$4 sm:$0xff]  }
  0x4d   : > { %v1013_v14 = vld [vmem:[%s1372_s29 + $0x80] ss:$16 sps:$4 sm:$0xff]   ;;  %v1014_v15 = vld [vmem:[%s1372_s29 + $0x88] ss:$16 sps:$4 sm:$0xff]   ;;  %v1015_v16 = vld [vmem:[%s1372_s29 + $0x64] ss:$16 sps:$4 sm:$0xff]  }
  0x4e   : > { %590 = vmatpush1.bf16.msra.mxu0 %v1001_v6  ;;  %643 = vmatpush1.bf16.msra.mxu1 %v1002_v7  ;;  %v1017_v17 = vld [vmem:[%s1372_s29 + $0x6c] ss:$16 sps:$4 sm:$0xff]   ;;  %v1019_v18 = vld [vmem:[%s1372_s29 + $0x60] ss:$16 sps:$4 sm:$0xff]   ;;  %v1020_v19 = vld [vmem:[%s1372_s29 + $0x68] ss:$16 sps:$4 sm:$0xff]  }
  0x4f   : > { %591 = vmatprep.subr.bf16.mxu0 %v1003_v8  ;;  %644 = vmatprep.subr.bf16.mxu1 %v1005_v9  ;;  %v1021_v20 = vld [vmem:[%s1372_s29 + $0x44] ss:$16 sps:$4 sm:$0xff]   ;;  %v1023_v21 = vld [vmem:[%s1372_s29 + $0x4c] ss:$16 sps:$4 sm:$0xff]   ;;  %v1025_v22 = vld [vmem:[%s1372_s29 + $0x40] ss:$16 sps:$4 sm:$0xff]  }
  0x50   : > { %v1026_v23 = vld [vmem:[%s1372_s29 + $0x48] ss:$16 sps:$4 sm:$0xff]   ;;  %v1027_v24 = vld [vmem:[%s1372_s29 + $0x24] ss:$16 sps:$4 sm:$0xff]   ;;  %v1029_v25 = vld [vmem:[%s1372_s29 + $0x2c] ss:$16 sps:$4 sm:$0xff]  }
  0x51   : > { %v1031_v26 = vld [vmem:[%s1372_s29 + $0x20] ss:$16 sps:$4 sm:$0xff]   ;;  %v1032_v27 = vld [vmem:[%s1372_s29 + $0x28] ss:$16 sps:$4 sm:$0xff]   ;;  %v1033_v28 = vld [vmem:[%s1372_s29 + $0x4] ss:$16 sps:$4 sm:$0xff]  }
  0x52   : > { %592 = vmatpush1.bf16.msra.mxu0 %v1007_v10  ;;  %645 = vmatpush1.bf16.msra.mxu1 %v1008_v11  ;;  %v1035_v29 = vld [vmem:[%s1372_s29 + $0xc] ss:$16 sps:$4 sm:$0xff]   ;;  %v1037_v30 = vld [vmem:[%s1372_s29] ss:$16 sps:$4 sm:$0xff]   ;;  %v1038_v31 = vld [vmem:[%s1372_s29 + $0x8] ss:$16 sps:$4 sm:$0xff]  }
  0x53   : > { %593 = vmatprep.subr.bf16.mxu0 %v1009_v12  ;;  %646 = vmatprep.subr.bf16.mxu1 %v1011_v13  ;;  %v1039_v32 = vld [vmem:[%s1372_s29 + $0x1e4] ss:$16 sps:$4 sm:$0xff]   ;;  %v1041_v33 = vld [vmem:[%s1372_s29 + $0x1ec] ss:$16 sps:$4 sm:$0xff]   ;;  %v1043_v34 = vld [vmem:[%s1372_s29 + $0x1e0] ss:$16 sps:$4 sm:$0xff]  }
  0x54   : > { %v1044_v35 = vld [vmem:[%s1372_s29 + $0x1e8] ss:$16 sps:$4 sm:$0xff]   ;;  %v1045_v36 = vld [vmem:[%s1372_s29 + $0x1c4] ss:$16 sps:$4 sm:$0xff]   ;;  %v1047_v37 = vld [vmem:[%s1372_s29 + $0x1cc] ss:$16 sps:$4 sm:$0xff]  }
  0x55   : > { %v1049_v38 = vld [vmem:[%s1372_s29 + $0x1c0] ss:$16 sps:$4 sm:$0xff]   ;;  %v1050_v39 = vld [vmem:[%s1372_s29 + $0x1c8] ss:$16 sps:$4 sm:$0xff]   ;;  %v1051_v40 = vld [vmem:[%s1372_s29 + $0x1a4] ss:$16 sps:$4 sm:$0xff]  }
  0x56   : > { %594 = vmatpush1.bf16.msra.mxu0 %v1013_v14  ;;  %647 = vmatpush1.bf16.msra.mxu1 %v1014_v15  ;;  %v1053_v41 = vld [vmem:[%s1372_s29 + $0x1ac] ss:$16 sps:$4 sm:$0xff]   ;;  %v1055_v42 = vld [vmem:[%s1372_s29 + $0x1a0] ss:$16 sps:$4 sm:$0xff]   ;;  %v1056_v43 = vld [vmem:[%s1372_s29 + $0x1a8] ss:$16 sps:$4 sm:$0xff]  }
  0x57   : > { %595 = vmatprep.subr.bf16.mxu0 %v1015_v16  ;;  %648 = vmatprep.subr.bf16.mxu1 %v1017_v17  ;;  %v1057_v44 = vld [vmem:[%s1372_s29 + $0x184] ss:$16 sps:$4 sm:$0xff]   ;;  %v1059_v45 = vld [vmem:[%s1372_s29 + $0x18c] ss:$16 sps:$4 sm:$0xff]   ;;  %v1061_v46 = vld [vmem:[%s1372_s29 + $0x180] ss:$16 sps:$4 sm:$0xff]  }
  0x58   : > { %v1089_v47 = vld [vmem:[#allocation2 + $0x4] ss:$8 sps:$4 sm:$0xff]   ;;  %v1062_v48 = vld [vmem:[%s1372_s29 + $0x188] ss:$16 sps:$4 sm:$0xff]   ;;  %v1067_v51 = vld [vmem:[%s1372_s29 + $0x160] ss:$16 sps:$4 sm:$0xff]  }
  0x59   : > { %v1063_v49 = vld [vmem:[%s1372_s29 + $0x164] ss:$16 sps:$4 sm:$0xff]   ;;  %v1065_v50 = vld [vmem:[%s1372_s29 + $0x16c] ss:$16 sps:$4 sm:$0xff]   ;;  %619 = vmatprep.mubr.bf16.mxu0 %v1089_v47  ;;  %672 = vmatprep.mubr.bf16.mxu1 %v1089_v47  ;;  %v1068_v52 = vld [vmem:[%s1372_s29 + $0x168] ss:$16 sps:$4 sm:$0xff]  }
  0x5a   : > { %596 = vmatpush1.bf16.msra.mxu0 %v1019_v18  ;;  %649 = vmatpush1.bf16.msra.mxu1 %v1020_v19  ;;  %v1069_v53 = vld [vmem:[%s1372_s29 + $0x144] ss:$16 sps:$4 sm:$0xff]   ;;  %v1071_v54 = vld [vmem:[%s1372_s29 + $0x14c] ss:$16 sps:$4 sm:$0xff]   ;;  %v1073_v55 = vld [vmem:[%s1372_s29 + $0x140] ss:$16 sps:$4 sm:$0xff]  }
  0x5b   : > { %597 = vmatprep.subr.bf16.mxu0 %v1021_v20  ;;  %650 = vmatprep.subr.bf16.mxu1 %v1023_v21  ;;  %v1074_v56 = vld [vmem:[%s1372_s29 + $0x148] ss:$16 sps:$4 sm:$0xff]   ;;  %v1075_v57 = vld [vmem:[%s1372_s29 + $0x124] ss:$16 sps:$4 sm:$0xff]   ;;  %v1077_v58 = vld [vmem:[%s1372_s29 + $0x12c] ss:$16 sps:$4 sm:$0xff]  }
  0x5c   : > { %v1079_v59 = vld [vmem:[%s1372_s29 + $0x120] ss:$16 sps:$4 sm:$0xff]   ;;  %v1080_v60 = vld [vmem:[%s1372_s29 + $0x128] ss:$16 sps:$4 sm:$0xff]   ;;  %v1081_v61 = vld [vmem:[%s1372_s29 + $0x104] ss:$16 sps:$4 sm:$0xff]  }
  0x5d   : > { %v1083_v62 = vld [vmem:[%s1372_s29 + $0x10c] ss:$16 sps:$4 sm:$0xff]   ;;  %v1085_v63 = vld [vmem:[%s1372_s29 + $0x100] ss:$16 sps:$4 sm:$0xff]   ;;  %v1086_v0 = vld [vmem:[%s1372_s29 + $0x108] ss:$16 sps:$4 sm:$0xff]  }
  0x5e   : > { %598 = vmatpush1.bf16.msra.mxu0 %v1025_v22  ;;  %651 = vmatpush1.bf16.msra.mxu1 %v1026_v23  ;;  %v1087_v1 = vld [vmem:[#allocation2] ss:$8 sps:$4 sm:$0xff]   ;;  %v1090_v2 = vld [vmem:[#allocation2 + $0x14] ss:$8 sps:$4 sm:$0xff]   ;;  %v1092_v3 = vld [vmem:[#allocation2 + $0x10] ss:$8 sps:$4 sm:$0xff]  }
  0x5f   : > { %599 = vmatprep.subr.bf16.mxu0 %v1027_v24  ;;  %652 = vmatprep.subr.bf16.mxu1 %v1029_v25  ;;  %s1443_s23 = scalar_lea.vmem [#allocation7], %s850_s20  ;;  %s925_s5 = sshll.u32 %s1264_s13, 9 }
  0x60   : > { %s755_s16 = sshll.u32 %s1443_s23, 4  ;;  %s1462_s19 = scalar_lea.hbm %s1512_s2, %s925_s5  ;;  %s1464_s16 = int_to_ptr.vmem [resolvable:$true] %s755_s16 }
  0x61   : > { %s742_s30 = scalar_lea.sflag [#allocation4], %s1368_s25  ;;  %s1147_s3 = scalar_lea.vmem %s1464_s16, 2048 }
  0x62   : > { %600 = vmatpush1.bf16.msra.mxu0 %v1031_v26  ;;  %653 = vmatpush1.bf16.msra.mxu1 %v1032_v27  ;;  %p1148_p13 = scmp.ne.s32.totalorder %s1464_s16, %s1147_s3  ;;  %p1528_p1 = scmp.ne.s32.totalorder %s1519_s21, 0 }
  0x63   : > { %601 = vmatprep.subr.bf16.mxu0 %v1033_v28  ;;  %654 = vmatprep.subr.bf16.mxu1 %v1035_v29  ;;  %s1224_s27 = smov [#allocation7]  }
  0x64   : > { %p1149_p0 = pnand %p1148_p13, %p1528_p1  ;;  %s1151_s4 = sshll.u32 %s1224_s27, 4  ;;  %s1152_s4 = int_to_ptr.vmem [resolvable:$false] %s1151_s4 }
  0x65   : > { %s1153_s6 = scalar_lea.vmem %s1152_s4, 4096  ;;  %p1154_p7 = scmp.lt.s32.totalorder %s1464_s16, %s1152_s4 }
  0x66   : > { %602 = vmatpush1.bf16.msra.mxu0 %v1037_v30  ;;  %655 = vmatpush1.bf16.msra.mxu1 %v1038_v31  ;;  %p1150_p3 = pneg %p1149_p0  ;;  %p1155_p8 = scmp.lt.s32.totalorder %s1153_s6, %s1147_s3 }
  0x67   : > { %603 = vmatprep.subr.bf16.mxu0 %v1039_v32  ;;  %656 = vmatprep.subr.bf16.mxu1 %v1041_v33 }
  0x68   : > { %p1156_p9 = por %p1155_p8, %p1154_p7 }
  0x6a   : > { %604 = vmatpush2.bf16.msra.mxu0 %v1043_v34  ;;  %657 = vmatpush2.bf16.msra.mxu1 %v1044_v35  ;;  %p1157_p10 = pnand %p1156_p9, %p1150_p3 }
  0x6b   : > { %605 = vmatprep.subr.bf16.mxu0 %v1045_v36  ;;  %658 = vmatprep.subr.bf16.mxu1 %v1047_v37 }
  0x6e   : > { %606 = vmatpush2.bf16.msra.mxu0 %v1049_v38  ;;  %659 = vmatpush2.bf16.msra.mxu1 %v1050_v39 }
  0x6f   : > { %607 = vmatprep.subr.bf16.mxu0 %v1051_v40  ;;  %660 = vmatprep.subr.bf16.mxu1 %v1053_v41 }
  0x72   : > { %608 = vmatpush2.bf16.msra.mxu0 %v1055_v42  ;;  %661 = vmatpush2.bf16.msra.mxu1 %v1056_v43 }
  0x73   : > { %609 = vmatprep.subr.bf16.mxu0 %v1057_v44  ;;  %662 = vmatprep.subr.bf16.mxu1 %v1059_v45 }
  0x76   : > { %610 = vmatpush2.bf16.msra.mxu0 %v1061_v46  ;;  %663 = vmatpush2.bf16.msra.mxu1 %v1062_v48 }
  0x77   : > { %611 = vmatprep.subr.bf16.mxu0 %v1063_v49  ;;  %664 = vmatprep.subr.bf16.mxu1 %v1065_v50 }
  0x7a   : > { %612 = vmatpush2.bf16.msra.mxu0 %v1067_v51  ;;  %665 = vmatpush2.bf16.msra.mxu1 %v1068_v52 }
  0x7b   : > { %613 = vmatprep.subr.bf16.mxu0 %v1069_v53  ;;  %666 = vmatprep.subr.bf16.mxu1 %v1071_v54 }
  0x7e   : > { %614 = vmatpush2.bf16.msra.mxu0 %v1073_v55  ;;  %667 = vmatpush2.bf16.msra.mxu1 %v1074_v56 }
  0x7f   : > { %615 = vmatprep.subr.bf16.mxu0 %v1075_v57  ;;  %668 = vmatprep.subr.bf16.mxu1 %v1077_v58 }
  0x82   : > { %616 = vmatpush2.bf16.msra.mxu0 %v1079_v59  ;;  %669 = vmatpush2.bf16.msra.mxu1 %v1080_v60 }
  0x83   : > { %617 = vmatprep.subr.bf16.mxu0 %v1081_v61  ;;  %670 = vmatprep.subr.bf16.mxu1 %v1083_v62 }
  0x86   : > { %618 = vmatpush2.bf16.msra.mxu0 %v1085_v63  ;;  %671 = vmatpush2.bf16.msra.mxu1 %v1086_v0 }
  0x89   : > { %620 = vmatmul.mubr.bf16.vlgmr.msra.gmra.mxu0 %v1087_v1  ;;  %673 = vmatmul.mubr.bf16.vlgmr.msra.gmra.mxu1 %v1087_v1 }
  0x8a   : > { %629 = vmatprep.mubr.bf16.mxu0 %v1090_v2  ;;  %682 = vmatprep.mubr.bf16.mxu1 %v1090_v2 }
  0x91   : > { %630 = vmatmul.mubr.bf16.gmra.mxu0 %v1092_v3  ;;  %683 = vmatmul.mubr.bf16.gmra.mxu1 %v1092_v3 }
 0x149   : > { %v621_v4 = vpop.f32.mrf.mxu0  ;;  %v674_v5 = vpop.f32.mrf.mxu1 }
 0x14a   : > { %v693_v6 = vmax.f32 %v621_v4, 0.0  ;;  %v695_v7 = vmax.f32 %v674_v5, 0.0 }
 0x14b   : > { %v623_v8 = vpop.f32.mrf.mxu0  ;;  %v676_v9 = vpop.f32.mrf.mxu1 }
 0x14c   : > { %v709_v10 = vmul.f32 0.91287094, %v693_v6  ;;  %v711_v11 = vmul.f32 0.91287094, %v695_v7  ;;  %v694_v12 = vmax.f32 %v623_v8, 0.0  ;;  %v696_v13 = vmax.f32 %v676_v9, 0.0 }
 0x14d   : > { %v625_v14 = vpop.f32.mrf.mxu0  ;;  %v678_v15 = vpop.f32.mrf.mxu1 }
 0x14e   : > { %725 = vst [vmem:[%s1443_s23] sm:$0xff] %v709_v10  ;;  %727 = vst [vmem:[%s1443_s23 + $0x10] sm:$0xff] %v711_v11  ;;  %v710_v16 = vmul.f32 0.91287094, %v694_v12  ;;  %v712_v17 = vmul.f32 0.91287094, %v696_v13  ;;  %v697_v18 = vmax.f32 %v625_v14, 0.0 }
 0x14f   : > { %v699_v19 = vmax.f32 %v678_v15, 0.0  ;;  %v627_v20 = vpop.f32.mrf.mxu0  ;;  %v680_v21 = vpop.f32.mrf.mxu1 }
 0x150   : > { %726 = vst [vmem:[%s1443_s23 + $0x8] sm:$0xff] %v710_v16  ;;  %728 = vst [vmem:[%s1443_s23 + $0x18] sm:$0xff] %v712_v17  ;;  %v713_v22 = vmul.f32 0.91287094, %v697_v18  ;;  %v698_v24 = vmax.f32 %v627_v20, 0.0  ;;  %v700_v25 = vmax.f32 %v680_v21, 0.0 }
 0x151   : > { %v715_v23 = vmul.f32 0.91287094, %v699_v19  ;;  %v631_v26 = vpop.f32.mrf.mxu0  ;;  %v684_v27 = vpop.f32.mrf.mxu1 }
 0x152   : > { %729 = vst [vmem:[%s1443_s23 + $0x20] sm:$0xff] %v713_v22  ;;  %v714_v28 = vmul.f32 0.91287094, %v698_v24  ;;  %v716_v29 = vmul.f32 0.91287094, %v700_v25  ;;  %v701_v30 = vmax.f32 %v631_v26, 0.0 }
 0x153   : > { %731 = vst [vmem:[%s1443_s23 + $0x30] sm:$0xff] %v715_v23  ;;  %v703_v31 = vmax.f32 %v684_v27, 0.0  ;;  %v633_v32 = vpop.f32.mrf.mxu0  ;;  %v686_v33 = vpop.f32.mrf.mxu1 }
 0x154   : > { %730 = vst [vmem:[%s1443_s23 + $0x28] sm:$0xff] %v714_v28  ;;  %732 = vst [vmem:[%s1443_s23 + $0x38] sm:$0xff] %v716_v29  ;;  %v717_v34 = vmul.f32 0.91287094, %v701_v30  ;;  %v702_v36 = vmax.f32 %v633_v32, 0.0  ;;  %v704_v37 = vmax.f32 %v686_v33, 0.0 }
 0x155   : > { %v719_v35 = vmul.f32 0.91287094, %v703_v31  ;;  %v635_v38 = vpop.f32.mrf.mxu0  ;;  %v688_v39 = vpop.f32.mrf.mxu1 }
 0x156   : > { %733 = vst [vmem:[%s1443_s23 + $0x40] sm:$0xff] %v717_v34  ;;  %v718_v40 = vmul.f32 0.91287094, %v702_v36  ;;  %v720_v41 = vmul.f32 0.91287094, %v704_v37  ;;  %v705_v42 = vmax.f32 %v635_v38, 0.0 }
 0x157   : > { %735 = vst [vmem:[%s1443_s23 + $0x50] sm:$0xff] %v719_v35  ;;  %v707_v43 = vmax.f32 %v688_v39, 0.0  ;;  %v637_v44 = vpop.f32.mrf.mxu0  ;;  %v690_v45 = vpop.f32.mrf.mxu1 }
 0x158   : > { %734 = vst [vmem:[%s1443_s23 + $0x48] sm:$0xff] %v718_v40  ;;  %736 = vst [vmem:[%s1443_s23 + $0x58] sm:$0xff] %v720_v41  ;;  %v721_v46 = vmul.f32 0.91287094, %v705_v42  ;;  %v706_v48 = vmax.f32 %v637_v44, 0.0  ;;  %v708_v49 = vmax.f32 %v690_v45, 0.0 }
 0x159   : > { %v723_v47 = vmul.f32 0.91287094, %v707_v43 }
 0x15a   : > { %737 = vst [vmem:[%s1443_s23 + $0x60] sm:$0xff] %v721_v46  ;;  %v722_v50 = vmul.f32 0.91287094, %v706_v48  ;;  %v724_v51 = vmul.f32 0.91287094, %v708_v49 }
 0x15b   : > { %739 = vst [vmem:[%s1443_s23 + $0x70] sm:$0xff] %v723_v47 }
 0x15c   : > { %738 = vst [vmem:[%s1443_s23 + $0x68] sm:$0xff] %v722_v50  ;;  %740 = vst [vmem:[%s1443_s23 + $0x78] sm:$0xff] %v724_v51 }
 0x15d   : > { %1160 = shalt.err (!%p1157_p10)
}
 0x15e   : > { %s1161_s7 = scalar_lea.hbm %s1462_s19, 2048  ;;  %s1165_s17 = scalar_lea.hbm %s1512_s2, 8192 }
 0x15f   : > { %p1162_p5 = scmp.ne.s32.totalorder %s1462_s19, %s1161_s7  ;;  %p1166_p12 = scmp.lt.s32.totalorder %s1462_s19, %s1512_s2 }
 0x160   : > { %p1167_p2 = scmp.lt.s32.totalorder %s1165_s17, %s1161_s7 }
 0x161   : > { %p1163_p11 = pnand %p1162_p5, %p1528_p1 }
 0x162   : > { %p1168_p4 = por %p1167_p2, %p1166_p12 }
 0x163   : > { %p1164_p6 = pneg %p1163_p11 }
 0x165   : > { %p1169_p13 = pnand %p1168_p4, %p1164_p6 }
 0x167   : > { %1172 = shalt.err (!%p1169_p13)
}
 0x168   : > { %s1225_s29 = smov 512   ;;  %s1226_s20 = smov 2048  }
 0x169   : > { %s1227_s23 = smov 32  }
 0x16a   : > { %932 = dma.vmem_to_hbm [thread:$0]  (%p1528_p1), %s1464_s16, 2048, %s1462_s19, %s742_s30, %s1225_s29, %s1226_s20, %s1227_s23  }
 0x16b PF: > { %p949_p0 = scmp.ge.s32.totalorder %s1215_s12, 2  ;;  %s770_s5 = sand.u32 1, %s1203_s9  }
 0x16c   : > { %p1529_p3 = scmp.ne.s32.totalorder %s1520_s22, 0  ;;  %s771_s13 = scalar_lea.sflag [#allocation4], %s770_s5 }
 0x16e   : > { %p943_p7 = pnand %p949_p0, %p1529_p3 }
 0x170   : > { %p944_p8 = pneg %p943_p7 }
 0x172   : > { %1198 = dma.done.wait (%p944_p8), %s771_s13, 2048  }
 0x173   : > { %1200 = vsyncadd (%p944_p8), %s771_s13, 4294965248  ;;  %p16_p9 = scmp.ge.s32.totalorder %s1268_s15, 6   ;;  %s1530_s9 = smov %s1207_s10 }
 0x174   : > { %s1531_s10 = smov %s1211_s11  ;;  %s1532_s11 = smov %s1280_s18 }
 0x175   : > { %s1533_s12 = smov %s1268_s15  ;;  %18 = sbr.rel (!%p16_p9) target bundleno = 6 (0x6), region = 78 }
 0x17a   :  { %776 = vsyncpa [#allocation3], 1 }
 0x17b   :  { %778 = vsyncpa [#allocation3 + $0x1], 1 }
 0x17c   :  { %779 = vsyncpa [#allocation6], 1 }
 0x17d   :  { %781 = vsyncpa [#allocation6 + $0x1], 1 }
 0x17e   :  { %782 = vsyncpa [#allocation4], 1 }
 0x17f   :  { %784 = vsyncpa [#allocation4 + $0x1], 1 }

</bundles_post_ra>
